<compile_context>
chip_gen: v7x
topology: tpu7x:2x2x1
jax: 0.10.0
libtpu: 0.0.40
codegen_flags: <defaults>
</compile_context>

<pallas_src>
import functools
import math

import jax
import jax.numpy as jnp
from jax import lax
from jax.experimental import pallas as pl
from jax.experimental.pallas import tpu as pltpu

LANE = 128          # TPU vreg lane width
SUBLANE = 8         # TPU vreg sublane count (f32)
_UNROLL_T = 16      # Python-unroll the recurrence up to this many timesteps


def _round_up(a, b):
    return (a + b - 1) // b * b


# ---------------------------------------------------------------------------
# Stochastic spiking path (out_u=False): LIF recurrence + noise + spike/reset.
# Block layout: (1, T, S_blk, 128) for x, noise1, noise2 and the spike output.
# ---------------------------------------------------------------------------
def _spike_kernel(x_ref, n1_ref, n2_ref, o_ref, *, tau, threshold, mu, sigma):
    T = x_ref.shape[1]
    rows, lanes = x_ref.shape[2], x_ref.shape[3]

    def step(t, u):
        # u = tau * u + x[:, t]
        u = tau * u + x_ref[0, t]
        # u += -Normal(mu, sigma)
        u = u - (mu + sigma * n1_ref[0, t])
        # StochasticST: o ~ Bernoulli(0.5*(1+erf(((u-thr)-mu)/(sigma*sqrt(2)))))
        #             == 1{ sigma*G + mu < u - thr },  G ~ N(0, 1)
        spike = (u - threshold - mu - sigma * n2_ref[0, t] > 0.0).astype(jnp.float32)
        o_ref[0, t] = spike.astype(o_ref.dtype)
        # hard reset: u = u * (1 - o)
        return u * (1.0 - spike)

    u = jnp.zeros((rows, lanes), jnp.float32)
    if T <= _UNROLL_T:
        for t in range(T):                       # small static T: full unroll
            u = step(t, u)
    else:
        u = lax.fori_loop(0, T, step, u, unroll=2)   # long T: bounded live ranges


# ---------------------------------------------------------------------------
# Silent path (out_u=True): u[:, t] = sum_{s<=t} tau^(t-s) x[:, s]  ==  L @ x.
# Block layout: L is (T, T), x / out blocks are (1, T, F_blk).
# ---------------------------------------------------------------------------
def _silent_kernel(l_ref, x_ref, o_ref):
    o_ref[0] = jnp.dot(
        l_ref[...], x_ref[0],
        preferred_element_type=jnp.float32,
        precision=jax.lax.Precision.HIGHEST,
    ).astype(o_ref.dtype)


def _silent_forward(xf, tau_inv, *, feature_block=2048):
    B, T, F = xf.shape
    f_blk = min(feature_block, _round_up(F, LANE))
    f_pad = _round_up(F, f_blk)
    if f_pad != F:
        xf = jnp.pad(xf, ((0, 0), (0, 0), (0, f_pad - F)))

    # Lower-triangular decay matrix: L[t, s] = tau_inv**(t-s) for s <= t else 0.
    idx = jnp.arange(T)
    diff = idx[:, None] - idx[None, :]
    decay = jnp.asarray(tau_inv, jnp.float32) ** jnp.maximum(diff, 0).astype(jnp.float32)
    L = jnp.where(diff >= 0, decay, 0.0).astype(jnp.float32)

    out = pl.pallas_call(
        _silent_kernel,
        out_shape=jax.ShapeDtypeStruct((B, T, f_pad), jnp.float32),
        grid=(B, f_pad // f_blk),
        in_specs=[
            pl.BlockSpec((T, T), lambda b, f: (0, 0)),
            pl.BlockSpec((1, T, f_blk), lambda b, f: (b, 0, f)),
        ],
        out_specs=pl.BlockSpec((1, T, f_blk), lambda b, f: (b, 0, f)),
        compiler_params=pltpu.CompilerParams(
            dimension_semantics=("parallel", "parallel")),
    )(L, xf)
    return out[:, :, :F]


# ---------------------------------------------------------------------------
# Wrapper: Neuron.forward(x, out_u)
# ---------------------------------------------------------------------------
def neuron_forward(x, seed=0, *, tau=2.0, threshold=1.0, mu=0.0, sigma=0.4,
                   out_u=False, feature_block_sublanes=64,
                   vmem_budget_bytes=8 * 1024 * 1024):
    """Pallas equivalent of Neuron.forward(x, out_u); x is [B, T, *feature_dims]."""
    x = jnp.asarray(x, jnp.float32)
    orig_shape = x.shape
    B, T = x.shape[0], x.shape[1]
    F = math.prod(x.shape[2:])
    xf = x.reshape(B, T, F)
    tau_inv = 1.0 / float(tau)          # the module stores self.tau = 1/tau

    if out_u:
        return _silent_forward(xf, tau_inv).reshape(orig_shape)

    # --- sublane-dense feature layout: [B, T, S_pad, 128] ---
    S = _round_up(F, LANE) // LANE
    # bytes per sublane-row per block: 4 f32 arrays (x, n1, n2, o), double-buffered
    bytes_per_row = T * LANE * 4 * 4 * 2
    max_rows = max(SUBLANE,
                   (vmem_budget_bytes // bytes_per_row) // SUBLANE * SUBLANE)
    s_blk = min(_round_up(S, SUBLANE), feature_block_sublanes, max_rows)
    s_pad = _round_up(S, s_blk)
    f_pad = s_pad * LANE
    if f_pad != F:
        xf = jnp.pad(xf, ((0, 0), (0, 0), (0, f_pad - F)))
    x4 = xf.reshape(B, T, s_pad, LANE)

    # Host-side standard-normal draws (noise injection + spike comparison).
    k1, k2 = jax.random.split(jax.random.PRNGKey(int(seed)))
    n1 = jax.random.normal(k1, (B, T, s_pad, LANE), jnp.float32)
    n2 = jax.random.normal(k2, (B, T, s_pad, LANE), jnp.float32)

    kernel = functools.partial(
        _spike_kernel,
        tau=tau_inv, threshold=float(threshold),
        mu=float(mu), sigma=float(sigma),
    )
    spec = pl.BlockSpec((1, T, s_blk, LANE), lambda b, f: (b, 0, f, 0))

    out = pl.pallas_call(
        kernel,
        out_shape=jax.ShapeDtypeStruct((B, T, s_pad, LANE), jnp.float32),
        grid=(B, s_pad // s_blk),
        in_specs=[spec, spec, spec],
        out_specs=spec,
        compiler_params=pltpu.CompilerParams(
            dimension_semantics=("parallel", "parallel")),
    )(x4, n1, n2)

    out = out.reshape(B, T, f_pad)[:, :, :F]
    return out.reshape(orig_shape)


def _silent_reference(x, tau=2.0):
    # pure-JAX reference for the deterministic out_u=True path
    tau_inv = 1.0 / tau
    u = jnp.zeros_like(x[:, 0])
    outs = []
    for t in range(x.shape[1]):
        u = tau_inv * u + x[:, t]
        outs.append(u)
    return jnp.stack(outs, axis=1)


if __name__ == "__main__":
    key = jax.random.PRNGKey(0)

    # [B, T, C, H, W] as in the PyTorch module
    B, T, C, H, W = 2, 8, 4, 16, 16
    x = jax.random.normal(key, (B, T, C, H, W), dtype=jnp.float32)

    # main stochastic spiking path (out_u=False, default)
    spikes = neuron_forward(x, seed=0)
    jax.block_until_ready(spikes)
    assert spikes.shape == x.shape
    assert bool(jnp.all((spikes == 0.0) | (spikes == 1.0))), "spikes must be binary"

    # deterministic membrane-potential path (out_u=True), MXU matmul formulation
    u_out = neuron_forward(x, seed=0, out_u=True)
    jax.block_until_ready(u_out)
    assert bool(jnp.allclose(u_out, _silent_reference(x), atol=1e-4, rtol=1e-4)), \
        "silent path mismatch"

    # longer sequence + non-128-multiple feature count: exercises the padding
    # path and the lax.fori_loop recurrence (T > unroll cutoff)
    x_long = jax.random.normal(jax.random.PRNGKey(1), (2, 24, 4, 12, 10),
                               dtype=jnp.float32)
    spikes_long = neuron_forward(x_long, seed=3)
    jax.block_until_ready(spikes_long)
    assert spikes_long.shape == x_long.shape
    assert bool(jnp.all((spikes_long == 0.0) | (spikes_long == 1.0)))

    u_long = neuron_forward(x_long, seed=3, out_u=True)
    jax.block_until_ready(u_long)
    assert bool(jnp.allclose(u_long, _silent_reference(x_long),
                             atol=1e-4, rtol=1e-4)), "long silent path mismatch"

    print("KERNEL_OK")
</pallas_src>

<mosaic_0001>
module attributes {stable_mosaic.version = 11 : i64} {
  func.func @_spike_kernel(%arg0: i32, %arg1: i32, %arg2: memref<1x8x8x128xf32, #tpu.memory_space<vmem>>, %arg3: memref<1x8x8x128xf32, #tpu.memory_space<vmem>>, %arg4: memref<1x8x8x128xf32, #tpu.memory_space<vmem>>, %arg5: memref<1x8x8x128xf32, #tpu.memory_space<vmem>>) attributes {dimension_semantics = [#tpu.dimension_semantics<parallel>, #tpu.dimension_semantics<parallel>], iteration_bounds = array<i64: 2, 1>, scalar_prefetch = 0 : i64, scratch_operands = 0 : i64, tpu.core_type = #tpu.core_type<tc>, window_params = [{transform_indices = @transform_0, window_bounds = array<i64: 1, 8, 8, 128>}, {transform_indices = @transform_1, window_bounds = array<i64: 1, 8, 8, 128>}, {transform_indices = @transform_2, window_bounds = array<i64: 1, 8, 8, 128>}, {transform_indices = @transform_3, window_bounds = array<i64: 1, 8, 8, 128>}]} {
    %cst = arith.constant 0.000000e+00 : f32
    %0 = vector.broadcast %cst : f32 to vector<8x128xf32>
    %cst_0 = arith.constant 5.000000e-01 : f32
    %1 = vector.broadcast %cst_0 : f32 to vector<8x128xf32>
    %2 = arith.mulf %1, %0 : vector<8x128xf32>
    %c0 = arith.constant 0 : index
    %c0_1 = arith.constant 0 : index
    %c0_2 = arith.constant 0 : index
    %c0_3 = arith.constant 0 : index
    %3 = vector.load %arg2[%c0, %c0_1, %c0_2, %c0_3] : memref<1x8x8x128xf32, #tpu.memory_space<vmem>>, vector<1x1x8x128xf32>
    %4 = vector.shape_cast %3 : vector<1x1x8x128xf32> to vector<8x128xf32>
    %5 = arith.addf %2, %4 : vector<8x128xf32>
    %c0_4 = arith.constant 0 : index
    %c0_5 = arith.constant 0 : index
    %c0_6 = arith.constant 0 : index
    %c0_7 = arith.constant 0 : index
    %6 = vector.load %arg3[%c0_4, %c0_5, %c0_6, %c0_7] : memref<1x8x8x128xf32, #tpu.memory_space<vmem>>, vector<1x1x8x128xf32>
    %7 = vector.shape_cast %6 : vector<1x1x8x128xf32> to vector<8x128xf32>
    %cst_8 = arith.constant 4.000000e-01 : f32
    %8 = vector.broadcast %cst_8 : f32 to vector<8x128xf32>
    %9 = arith.mulf %8, %7 : vector<8x128xf32>
    %cst_9 = arith.constant 0.000000e+00 : f32
    %10 = vector.broadcast %cst_9 : f32 to vector<8x128xf32>
    %11 = arith.addf %10, %9 : vector<8x128xf32>
    %12 = arith.subf %5, %11 : vector<8x128xf32>
    %cst_10 = arith.constant 1.000000e+00 : f32
    %13 = vector.broadcast %cst_10 : f32 to vector<8x128xf32>
    %14 = arith.subf %12, %13 : vector<8x128xf32>
    %cst_11 = arith.constant 0.000000e+00 : f32
    %15 = vector.broadcast %cst_11 : f32 to vector<8x128xf32>
    %16 = arith.subf %14, %15 : vector<8x128xf32>
    %c0_12 = arith.constant 0 : index
    %c0_13 = arith.constant 0 : index
    %c0_14 = arith.constant 0 : index
    %c0_15 = arith.constant 0 : index
    %17 = vector.load %arg4[%c0_12, %c0_13, %c0_14, %c0_15] : memref<1x8x8x128xf32, #tpu.memory_space<vmem>>, vector<1x1x8x128xf32>
    %18 = vector.shape_cast %17 : vector<1x1x8x128xf32> to vector<8x128xf32>
    %cst_16 = arith.constant 4.000000e-01 : f32
    %19 = vector.broadcast %cst_16 : f32 to vector<8x128xf32>
    %20 = arith.mulf %19, %18 : vector<8x128xf32>
    %21 = arith.subf %16, %20 : vector<8x128xf32>
    %cst_17 = arith.constant 0.000000e+00 : f32
    %22 = vector.broadcast %cst_17 : f32 to vector<8x128xf32>
    %23 = arith.cmpf ogt, %21, %22 : vector<8x128xf32>
    %24 = arith.extui %23 : vector<8x128xi1> to vector<8x128xi32>
    %25 = arith.sitofp %24 : vector<8x128xi32> to vector<8x128xf32>
    %c0_18 = arith.constant 0 : index
    %c0_19 = arith.constant 0 : index
    %c0_20 = arith.constant 0 : index
    %c0_21 = arith.constant 0 : index
    %26 = vector.load %arg5[%c0_18, %c0_19, %c0_20, %c0_21] : memref<1x8x8x128xf32, #tpu.memory_space<vmem>>, vector<1x1x8x128xf32>
    %27 = vector.shape_cast %26 : vector<1x1x8x128xf32> to vector<8x128xf32>
    %28 = vector.shape_cast %25 : vector<8x128xf32> to vector<1x1x8x128xf32>
    tpu.vector_store %arg5[%c0_18, %c0_19, %c0_20, %c0_21], %28 {strides = array<i32>} : memref<1x8x8x128xf32, #tpu.memory_space<vmem>>, vector<1x1x8x128xf32>,
    %cst_22 = arith.constant 1.000000e+00 : f32
    %29 = vector.broadcast %cst_22 : f32 to vector<8x128xf32>
    %30 = arith.subf %29, %25 : vector<8x128xf32>
    %31 = arith.mulf %12, %30 : vector<8x128xf32>
    %cst_23 = arith.constant 5.000000e-01 : f32
    %32 = vector.broadcast %cst_23 : f32 to vector<8x128xf32>
    %33 = arith.mulf %32, %31 : vector<8x128xf32>
    %c0_24 = arith.constant 0 : index
    %c1 = arith.constant 1 : index
    %c0_25 = arith.constant 0 : index
    %c0_26 = arith.constant 0 : index
    %34 = vector.load %arg2[%c0_24, %c1, %c0_25, %c0_26] : memref<1x8x8x128xf32, #tpu.memory_space<vmem>>, vector<1x1x8x128xf32>
    %35 = vector.shape_cast %34 : vector<1x1x8x128xf32> to vector<8x128xf32>
    %36 = arith.addf %33, %35 : vector<8x128xf32>
    %c0_27 = arith.constant 0 : index
    %c1_28 = arith.constant 1 : index
    %c0_29 = arith.constant 0 : index
    %c0_30 = arith.constant 0 : index
    %37 = vector.load %arg3[%c0_27, %c1_28, %c0_29, %c0_30] : memref<1x8x8x128xf32, #tpu.memory_space<vmem>>, vector<1x1x8x128xf32>
    %38 = vector.shape_cast %37 : vector<1x1x8x128xf32> to vector<8x128xf32>
    %cst_31 = arith.constant 4.000000e-01 : f32
    %39 = vector.broadcast %cst_31 : f32 to vector<8x128xf32>
    %40 = arith.mulf %39, %38 : vector<8x128xf32>
    %cst_32 = arith.constant 0.000000e+00 : f32
    %41 = vector.broadcast %cst_32 : f32 to vector<8x128xf32>
    %42 = arith.addf %41, %40 : vector<8x128xf32>
    %43 = arith.subf %36, %42 : vector<8x128xf32>
    %cst_33 = arith.constant 1.000000e+00 : f32
    %44 = vector.broadcast %cst_33 : f32 to vector<8x128xf32>
    %45 = arith.subf %43, %44 : vector<8x128xf32>
    %cst_34 = arith.constant 0.000000e+00 : f32
    %46 = vector.broadcast %cst_34 : f32 to vector<8x128xf32>
    %47 = arith.subf %45, %46 : vector<8x128xf32>
    %c0_35 = arith.constant 0 : index
    %c1_36 = arith.constant 1 : index
    %c0_37 = arith.constant 0 : index
    %c0_38 = arith.constant 0 : index
    %48 = vector.load %arg4[%c0_35, %c1_36, %c0_37, %c0_38] : memref<1x8x8x128xf32, #tpu.memory_space<vmem>>, vector<1x1x8x128xf32>
    %49 = vector.shape_cast %48 : vector<1x1x8x128xf32> to vector<8x128xf32>
    %cst_39 = arith.constant 4.000000e-01 : f32
    %50 = vector.broadcast %cst_39 : f32 to vector<8x128xf32>
    %51 = arith.mulf %50, %49 : vector<8x128xf32>
    %52 = arith.subf %47, %51 : vector<8x128xf32>
    %cst_40 = arith.constant 0.000000e+00 : f32
    %53 = vector.broadcast %cst_40 : f32 to vector<8x128xf32>
    %54 = arith.cmpf ogt, %52, %53 : vector<8x128xf32>
    %55 = arith.extui %54 : vector<8x128xi1> to vector<8x128xi32>
    %56 = arith.sitofp %55 : vector<8x128xi32> to vector<8x128xf32>
    %c0_41 = arith.constant 0 : index
    %c1_42 = arith.constant 1 : index
    %c0_43 = arith.constant 0 : index
    %c0_44 = arith.constant 0 : index
    %57 = vector.load %arg5[%c0_41, %c1_42, %c0_43, %c0_44] : memref<1x8x8x128xf32, #tpu.memory_space<vmem>>, vector<1x1x8x128xf32>
    %58 = vector.shape_cast %57 : vector<1x1x8x128xf32> to vector<8x128xf32>
    %59 = vector.shape_cast %56 : vector<8x128xf32> to vector<1x1x8x128xf32>
    tpu.vector_store %arg5[%c0_41, %c1_42, %c0_43, %c0_44], %59 {strides = array<i32>} : memref<1x8x8x128xf32, #tpu.memory_space<vmem>>, vector<1x1x8x128xf32>,
    %cst_45 = arith.constant 1.000000e+00 : f32
    %60 = vector.broadcast %cst_45 : f32 to vector<8x128xf32>
    %61 = arith.subf %60, %56 : vector<8x128xf32>
    %62 = arith.mulf %43, %61 : vector<8x128xf32>
    %cst_46 = arith.constant 5.000000e-01 : f32
    %63 = vector.broadcast %cst_46 : f32 to vector<8x128xf32>
    %64 = arith.mulf %63, %62 : vector<8x128xf32>
    %c0_47 = arith.constant 0 : index
    %c2 = arith.constant 2 : index
    %c0_48 = arith.constant 0 : index
    %c0_49 = arith.constant 0 : index
    %65 = vector.load %arg2[%c0_47, %c2, %c0_48, %c0_49] : memref<1x8x8x128xf32, #tpu.memory_space<vmem>>, vector<1x1x8x128xf32>
    %66 = vector.shape_cast %65 : vector<1x1x8x128xf32> to vector<8x128xf32>
    %67 = arith.addf %64, %66 : vector<8x128xf32>
    %c0_50 = arith.constant 0 : index
    %c2_51 = arith.constant 2 : index
    %c0_52 = arith.constant 0 : index
    %c0_53 = arith.constant 0 : index
    %68 = vector.load %arg3[%c0_50, %c2_51, %c0_52, %c0_53] : memref<1x8x8x128xf32, #tpu.memory_space<vmem>>, vector<1x1x8x128xf32>
    %69 = vector.shape_cast %68 : vector<1x1x8x128xf32> to vector<8x128xf32>
    %cst_54 = arith.constant 4.000000e-01 : f32
    %70 = vector.broadcast %cst_54 : f32 to vector<8x128xf32>
    %71 = arith.mulf %70, %69 : vector<8x128xf32>
    %cst_55 = arith.constant 0.000000e+00 : f32
    %72 = vector.broadcast %cst_55 : f32 to vector<8x128xf32>
    %73 = arith.addf %72, %71 : vector<8x128xf32>
    %74 = arith.subf %67, %73 : vector<8x128xf32>
    %cst_56 = arith.constant 1.000000e+00 : f32
    %75 = vector.broadcast %cst_56 : f32 to vector<8x128xf32>
    %76 = arith.subf %74, %75 : vector<8x128xf32>
    %cst_57 = arith.constant 0.000000e+00 : f32
    %77 = vector.broadcast %cst_57 : f32 to vector<8x128xf32>
    %78 = arith.subf %76, %77 : vector<8x128xf32>
    %c0_58 = arith.constant 0 : index
    %c2_59 = arith.constant 2 : index
    %c0_60 = arith.constant 0 : index
    %c0_61 = arith.constant 0 : index
    %79 = vector.load %arg4[%c0_58, %c2_59, %c0_60, %c0_61] : memref<1x8x8x128xf32, #tpu.memory_space<vmem>>, vector<1x1x8x128xf32>
    %80 = vector.shape_cast %79 : vector<1x1x8x128xf32> to vector<8x128xf32>
    %cst_62 = arith.constant 4.000000e-01 : f32
    %81 = vector.broadcast %cst_62 : f32 to vector<8x128xf32>
    %82 = arith.mulf %81, %80 : vector<8x128xf32>
    %83 = arith.subf %78, %82 : vector<8x128xf32>
    %cst_63 = arith.constant 0.000000e+00 : f32
    %84 = vector.broadcast %cst_63 : f32 to vector<8x128xf32>
    %85 = arith.cmpf ogt, %83, %84 : vector<8x128xf32>
    %86 = arith.extui %85 : vector<8x128xi1> to vector<8x128xi32>
    %87 = arith.sitofp %86 : vector<8x128xi32> to vector<8x128xf32>
    %c0_64 = arith.constant 0 : index
    %c2_65 = arith.constant 2 : index
    %c0_66 = arith.constant 0 : index
    %c0_67 = arith.constant 0 : index
    %88 = vector.load %arg5[%c0_64, %c2_65, %c0_66, %c0_67] : memref<1x8x8x128xf32, #tpu.memory_space<vmem>>, vector<1x1x8x128xf32>
    %89 = vector.shape_cast %88 : vector<1x1x8x128xf32> to vector<8x128xf32>
    %90 = vector.shape_cast %87 : vector<8x128xf32> to vector<1x1x8x128xf32>
    tpu.vector_store %arg5[%c0_64, %c2_65, %c0_66, %c0_67], %90 {strides = array<i32>} : memref<1x8x8x128xf32, #tpu.memory_space<vmem>>, vector<1x1x8x128xf32>,
    %cst_68 = arith.constant 1.000000e+00 : f32
    %91 = vector.broadcast %cst_68 : f32 to vector<8x128xf32>
    %92 = arith.subf %91, %87 : vector<8x128xf32>
    %93 = arith.mulf %74, %92 : vector<8x128xf32>
    %cst_69 = arith.constant 5.000000e-01 : f32
    %94 = vector.broadcast %cst_69 : f32 to vector<8x128xf32>
    %95 = arith.mulf %94, %93 : vector<8x128xf32>
    %c0_70 = arith.constant 0 : index
    %c3 = arith.constant 3 : index
    %c0_71 = arith.constant 0 : index
    %c0_72 = arith.constant 0 : index
    %96 = vector.load %arg2[%c0_70, %c3, %c0_71, %c0_72] : memref<1x8x8x128xf32, #tpu.memory_space<vmem>>, vector<1x1x8x128xf32>
    %97 = vector.shape_cast %96 : vector<1x1x8x128xf32> to vector<8x128xf32>
    %98 = arith.addf %95, %97 : vector<8x128xf32>
    %c0_73 = arith.constant 0 : index
    %c3_74 = arith.constant 3 : index
    %c0_75 = arith.constant 0 : index
    %c0_76 = arith.constant 0 : index
    %99 = vector.load %arg3[%c0_73, %c3_74, %c0_75, %c0_76] : memref<1x8x8x128xf32, #tpu.memory_space<vmem>>, vector<1x1x8x128xf32>
    %100 = vector.shape_cast %99 : vector<1x1x8x128xf32> to vector<8x128xf32>
    %cst_77 = arith.constant 4.000000e-01 : f32
    %101 = vector.broadcast %cst_77 : f32 to vector<8x128xf32>
    %102 = arith.mulf %101, %100 : vector<8x128xf32>
    %cst_78 = arith.constant 0.000000e+00 : f32
    %103 = vector.broadcast %cst_78 : f32 to vector<8x128xf32>
    %104 = arith.addf %103, %102 : vector<8x128xf32>
    %105 = arith.subf %98, %104 : vector<8x128xf32>
    %cst_79 = arith.constant 1.000000e+00 : f32
    %106 = vector.broadcast %cst_79 : f32 to vector<8x128xf32>
    %107 = arith.subf %105, %106 : vector<8x128xf32>
    %cst_80 = arith.constant 0.000000e+00 : f32
    %108 = vector.broadcast %cst_80 : f32 to vector<8x128xf32>
    %109 = arith.subf %107, %108 : vector<8x128xf32>
    %c0_81 = arith.constant 0 : index
    %c3_82 = arith.constant 3 : index
    %c0_83 = arith.constant 0 : index
    %c0_84 = arith.constant 0 : index
    %110 = vector.load %arg4[%c0_81, %c3_82, %c0_83, %c0_84] : memref<1x8x8x128xf32, #tpu.memory_space<vmem>>, vector<1x1x8x128xf32>
    %111 = vector.shape_cast %110 : vector<1x1x8x128xf32> to vector<8x128xf32>
    %cst_85 = arith.constant 4.000000e-01 : f32
    %112 = vector.broadcast %cst_85 : f32 to vector<8x128xf32>
    %113 = arith.mulf %112, %111 : vector<8x128xf32>
    %114 = arith.subf %109, %113 : vector<8x128xf32>
    %cst_86 = arith.constant 0.000000e+00 : f32
    %115 = vector.broadcast %cst_86 : f32 to vector<8x128xf32>
    %116 = arith.cmpf ogt, %114, %115 : vector<8x128xf32>
    %117 = arith.extui %116 : vector<8x128xi1> to vector<8x128xi32>
    %118 = arith.sitofp %117 : vector<8x128xi32> to vector<8x128xf32>
    %c0_87 = arith.constant 0 : index
    %c3_88 = arith.constant 3 : index
    %c0_89 = arith.constant 0 : index
    %c0_90 = arith.constant 0 : index
    %119 = vector.load %arg5[%c0_87, %c3_88, %c0_89, %c0_90] : memref<1x8x8x128xf32, #tpu.memory_space<vmem>>, vector<1x1x8x128xf32>
    %120 = vector.shape_cast %119 : vector<1x1x8x128xf32> to vector<8x128xf32>
    %121 = vector.shape_cast %118 : vector<8x128xf32> to vector<1x1x8x128xf32>
    tpu.vector_store %arg5[%c0_87, %c3_88, %c0_89, %c0_90], %121 {strides = array<i32>} : memref<1x8x8x128xf32, #tpu.memory_space<vmem>>, vector<1x1x8x128xf32>,
    %cst_91 = arith.constant 1.000000e+00 : f32
    %122 = vector.broadcast %cst_91 : f32 to vector<8x128xf32>
    %123 = arith.subf %122, %118 : vector<8x128xf32>
    %124 = arith.mulf %105, %123 : vector<8x128xf32>
    %cst_92 = arith.constant 5.000000e-01 : f32
    %125 = vector.broadcast %cst_92 : f32 to vector<8x128xf32>
    %126 = arith.mulf %125, %124 : vector<8x128xf32>
    %c0_93 = arith.constant 0 : index
    %c4 = arith.constant 4 : index
    %c0_94 = arith.constant 0 : index
    %c0_95 = arith.constant 0 : index
    %127 = vector.load %arg2[%c0_93, %c4, %c0_94, %c0_95] : memref<1x8x8x128xf32, #tpu.memory_space<vmem>>, vector<1x1x8x128xf32>
    %128 = vector.shape_cast %127 : vector<1x1x8x128xf32> to vector<8x128xf32>
    %129 = arith.addf %126, %128 : vector<8x128xf32>
    %c0_96 = arith.constant 0 : index
    %c4_97 = arith.constant 4 : index
    %c0_98 = arith.constant 0 : index
    %c0_99 = arith.constant 0 : index
    %130 = vector.load %arg3[%c0_96, %c4_97, %c0_98, %c0_99] : memref<1x8x8x128xf32, #tpu.memory_space<vmem>>, vector<1x1x8x128xf32>
    %131 = vector.shape_cast %130 : vector<1x1x8x128xf32> to vector<8x128xf32>
    %cst_100 = arith.constant 4.000000e-01 : f32
    %132 = vector.broadcast %cst_100 : f32 to vector<8x128xf32>
    %133 = arith.mulf %132, %131 : vector<8x128xf32>
    %cst_101 = arith.constant 0.000000e+00 : f32
    %134 = vector.broadcast %cst_101 : f32 to vector<8x128xf32>
    %135 = arith.addf %134, %133 : vector<8x128xf32>
    %136 = arith.subf %129, %135 : vector<8x128xf32>
    %cst_102 = arith.constant 1.000000e+00 : f32
    %137 = vector.broadcast %cst_102 : f32 to vector<8x128xf32>
    %138 = arith.subf %136, %137 : vector<8x128xf32>
    %cst_103 = arith.constant 0.000000e+00 : f32
    %139 = vector.broadcast %cst_103 : f32 to vector<8x128xf32>
    %140 = arith.subf %138, %139 : vector<8x128xf32>
    %c0_104 = arith.constant 0 : index
    %c4_105 = arith.constant 4 : index
    %c0_106 = arith.constant 0 : index
    %c0_107 = arith.constant 0 : index
    %141 = vector.load %arg4[%c0_104, %c4_105, %c0_106, %c0_107] : memref<1x8x8x128xf32, #tpu.memory_space<vmem>>, vector<1x1x8x128xf32>
    %142 = vector.shape_cast %141 : vector<1x1x8x128xf32> to vector<8x128xf32>
    %cst_108 = arith.constant 4.000000e-01 : f32
    %143 = vector.broadcast %cst_108 : f32 to vector<8x128xf32>
    %144 = arith.mulf %143, %142 : vector<8x128xf32>
    %145 = arith.subf %140, %144 : vector<8x128xf32>
    %cst_109 = arith.constant 0.000000e+00 : f32
    %146 = vector.broadcast %cst_109 : f32 to vector<8x128xf32>
    %147 = arith.cmpf ogt, %145, %146 : vector<8x128xf32>
    %148 = arith.extui %147 : vector<8x128xi1> to vector<8x128xi32>
    %149 = arith.sitofp %148 : vector<8x128xi32> to vector<8x128xf32>
    %c0_110 = arith.constant 0 : index
    %c4_111 = arith.constant 4 : index
    %c0_112 = arith.constant 0 : index
    %c0_113 = arith.constant 0 : index
    %150 = vector.load %arg5[%c0_110, %c4_111, %c0_112, %c0_113] : memref<1x8x8x128xf32, #tpu.memory_space<vmem>>, vector<1x1x8x128xf32>
    %151 = vector.shape_cast %150 : vector<1x1x8x128xf32> to vector<8x128xf32>
    %152 = vector.shape_cast %149 : vector<8x128xf32> to vector<1x1x8x128xf32>
    tpu.vector_store %arg5[%c0_110, %c4_111, %c0_112, %c0_113], %152 {strides = array<i32>} : memref<1x8x8x128xf32, #tpu.memory_space<vmem>>, vector<1x1x8x128xf32>,
    %cst_114 = arith.constant 1.000000e+00 : f32
    %153 = vector.broadcast %cst_114 : f32 to vector<8x128xf32>
    %154 = arith.subf %153, %149 : vector<8x128xf32>
    %155 = arith.mulf %136, %154 : vector<8x128xf32>
    %cst_115 = arith.constant 5.000000e-01 : f32
    %156 = vector.broadcast %cst_115 : f32 to vector<8x128xf32>
    %157 = arith.mulf %156, %155 : vector<8x128xf32>
    %c0_116 = arith.constant 0 : index
    %c5 = arith.constant 5 : index
    %c0_117 = arith.constant 0 : index
    %c0_118 = arith.constant 0 : index
    %158 = vector.load %arg2[%c0_116, %c5, %c0_117, %c0_118] : memref<1x8x8x128xf32, #tpu.memory_space<vmem>>, vector<1x1x8x128xf32>
    %159 = vector.shape_cast %158 : vector<1x1x8x128xf32> to vector<8x128xf32>
    %160 = arith.addf %157, %159 : vector<8x128xf32>
    %c0_119 = arith.constant 0 : index
    %c5_120 = arith.constant 5 : index
    %c0_121 = arith.constant 0 : index
    %c0_122 = arith.constant 0 : index
    %161 = vector.load %arg3[%c0_119, %c5_120, %c0_121, %c0_122] : memref<1x8x8x128xf32, #tpu.memory_space<vmem>>, vector<1x1x8x128xf32>
    %162 = vector.shape_cast %161 : vector<1x1x8x128xf32> to vector<8x128xf32>
    %cst_123 = arith.constant 4.000000e-01 : f32
    %163 = vector.broadcast %cst_123 : f32 to vector<8x128xf32>
    %164 = arith.mulf %163, %162 : vector<8x128xf32>
    %cst_124 = arith.constant 0.000000e+00 : f32
    %165 = vector.broadcast %cst_124 : f32 to vector<8x128xf32>
    %166 = arith.addf %165, %164 : vector<8x128xf32>
    %167 = arith.subf %160, %166 : vector<8x128xf32>
    %cst_125 = arith.constant 1.000000e+00 : f32
    %168 = vector.broadcast %cst_125 : f32 to vector<8x128xf32>
    %169 = arith.subf %167, %168 : vector<8x128xf32>
    %cst_126 = arith.constant 0.000000e+00 : f32
    %170 = vector.broadcast %cst_126 : f32 to vector<8x128xf32>
    %171 = arith.subf %169, %170 : vector<8x128xf32>
    %c0_127 = arith.constant 0 : index
    %c5_128 = arith.constant 5 : index
    %c0_129 = arith.constant 0 : index
    %c0_130 = arith.constant 0 : index
    %172 = vector.load %arg4[%c0_127, %c5_128, %c0_129, %c0_130] : memref<1x8x8x128xf32, #tpu.memory_space<vmem>>, vector<1x1x8x128xf32>
    %173 = vector.shape_cast %172 : vector<1x1x8x128xf32> to vector<8x128xf32>
    %cst_131 = arith.constant 4.000000e-01 : f32
    %174 = vector.broadcast %cst_131 : f32 to vector<8x128xf32>
    %175 = arith.mulf %174, %173 : vector<8x128xf32>
    %176 = arith.subf %171, %175 : vector<8x128xf32>
    %cst_132 = arith.constant 0.000000e+00 : f32
    %177 = vector.broadcast %cst_132 : f32 to vector<8x128xf32>
    %178 = arith.cmpf ogt, %176, %177 : vector<8x128xf32>
    %179 = arith.extui %178 : vector<8x128xi1> to vector<8x128xi32>
    %180 = arith.sitofp %179 : vector<8x128xi32> to vector<8x128xf32>
    %c0_133 = arith.constant 0 : index
    %c5_134 = arith.constant 5 : index
    %c0_135 = arith.constant 0 : index
    %c0_136 = arith.constant 0 : index
    %181 = vector.load %arg5[%c0_133, %c5_134, %c0_135, %c0_136] : memref<1x8x8x128xf32, #tpu.memory_space<vmem>>, vector<1x1x8x128xf32>
    %182 = vector.shape_cast %181 : vector<1x1x8x128xf32> to vector<8x128xf32>
    %183 = vector.shape_cast %180 : vector<8x128xf32> to vector<1x1x8x128xf32>
    tpu.vector_store %arg5[%c0_133, %c5_134, %c0_135, %c0_136], %183 {strides = array<i32>} : memref<1x8x8x128xf32, #tpu.memory_space<vmem>>, vector<1x1x8x128xf32>,
    %cst_137 = arith.constant 1.000000e+00 : f32
    %184 = vector.broadcast %cst_137 : f32 to vector<8x128xf32>
    %185 = arith.subf %184, %180 : vector<8x128xf32>
    %186 = arith.mulf %167, %185 : vector<8x128xf32>
    %cst_138 = arith.constant 5.000000e-01 : f32
    %187 = vector.broadcast %cst_138 : f32 to vector<8x128xf32>
    %188 = arith.mulf %187, %186 : vector<8x128xf32>
    %c0_139 = arith.constant 0 : index
    %c6 = arith.constant 6 : index
    %c0_140 = arith.constant 0 : index
    %c0_141 = arith.constant 0 : index
    %189 = vector.load %arg2[%c0_139, %c6, %c0_140, %c0_141] : memref<1x8x8x128xf32, #tpu.memory_space<vmem>>, vector<1x1x8x128xf32>
    %190 = vector.shape_cast %189 : vector<1x1x8x128xf32> to vector<8x128xf32>
    %191 = arith.addf %188, %190 : vector<8x128xf32>
    %c0_142 = arith.constant 0 : index
    %c6_143 = arith.constant 6 : index
    %c0_144 = arith.constant 0 : index
    %c0_145 = arith.constant 0 : index
    %192 = vector.load %arg3[%c0_142, %c6_143, %c0_144, %c0_145] : memref<1x8x8x128xf32, #tpu.memory_space<vmem>>, vector<1x1x8x128xf32>
    %193 = vector.shape_cast %192 : vector<1x1x8x128xf32> to vector<8x128xf32>
    %cst_146 = arith.constant 4.000000e-01 : f32
    %194 = vector.broadcast %cst_146 : f32 to vector<8x128xf32>
    %195 = arith.mulf %194, %193 : vector<8x128xf32>
    %cst_147 = arith.constant 0.000000e+00 : f32
    %196 = vector.broadcast %cst_147 : f32 to vector<8x128xf32>
    %197 = arith.addf %196, %195 : vector<8x128xf32>
    %198 = arith.subf %191, %197 : vector<8x128xf32>
    %cst_148 = arith.constant 1.000000e+00 : f32
    %199 = vector.broadcast %cst_148 : f32 to vector<8x128xf32>
    %200 = arith.subf %198, %199 : vector<8x128xf32>
    %cst_149 = arith.constant 0.000000e+00 : f32
    %201 = vector.broadcast %cst_149 : f32 to vector<8x128xf32>
    %202 = arith.subf %200, %201 : vector<8x128xf32>
    %c0_150 = arith.constant 0 : index
    %c6_151 = arith.constant 6 : index
    %c0_152 = arith.constant 0 : index
    %c0_153 = arith.constant 0 : index
    %203 = vector.load %arg4[%c0_150, %c6_151, %c0_152, %c0_153] : memref<1x8x8x128xf32, #tpu.memory_space<vmem>>, vector<1x1x8x128xf32>
    %204 = vector.shape_cast %203 : vector<1x1x8x128xf32> to vector<8x128xf32>
    %cst_154 = arith.constant 4.000000e-01 : f32
    %205 = vector.broadcast %cst_154 : f32 to vector<8x128xf32>
    %206 = arith.mulf %205, %204 : vector<8x128xf32>
    %207 = arith.subf %202, %206 : vector<8x128xf32>
    %cst_155 = arith.constant 0.000000e+00 : f32
    %208 = vector.broadcast %cst_155 : f32 to vector<8x128xf32>
    %209 = arith.cmpf ogt, %207, %208 : vector<8x128xf32>
    %210 = arith.extui %209 : vector<8x128xi1> to vector<8x128xi32>
    %211 = arith.sitofp %210 : vector<8x128xi32> to vector<8x128xf32>
    %c0_156 = arith.constant 0 : index
    %c6_157 = arith.constant 6 : index
    %c0_158 = arith.constant 0 : index
    %c0_159 = arith.constant 0 : index
    %212 = vector.load %arg5[%c0_156, %c6_157, %c0_158, %c0_159] : memref<1x8x8x128xf32, #tpu.memory_space<vmem>>, vector<1x1x8x128xf32>
    %213 = vector.shape_cast %212 : vector<1x1x8x128xf32> to vector<8x128xf32>
    %214 = vector.shape_cast %211 : vector<8x128xf32> to vector<1x1x8x128xf32>
    tpu.vector_store %arg5[%c0_156, %c6_157, %c0_158, %c0_159], %214 {strides = array<i32>} : memref<1x8x8x128xf32, #tpu.memory_space<vmem>>, vector<1x1x8x128xf32>,
    %cst_160 = arith.constant 1.000000e+00 : f32
    %215 = vector.broadcast %cst_160 : f32 to vector<8x128xf32>
    %216 = arith.subf %215, %211 : vector<8x128xf32>
    %217 = arith.mulf %198, %216 : vector<8x128xf32>
    %cst_161 = arith.constant 5.000000e-01 : f32
    %218 = vector.broadcast %cst_161 : f32 to vector<8x128xf32>
    %219 = arith.mulf %218, %217 : vector<8x128xf32>
    %c0_162 = arith.constant 0 : index
    %c7 = arith.constant 7 : index
    %c0_163 = arith.constant 0 : index
    %c0_164 = arith.constant 0 : index
    %220 = vector.load %arg2[%c0_162, %c7, %c0_163, %c0_164] : memref<1x8x8x128xf32, #tpu.memory_space<vmem>>, vector<1x1x8x128xf32>
    %221 = vector.shape_cast %220 : vector<1x1x8x128xf32> to vector<8x128xf32>
    %222 = arith.addf %219, %221 : vector<8x128xf32>
    %c0_165 = arith.constant 0 : index
    %c7_166 = arith.constant 7 : index
    %c0_167 = arith.constant 0 : index
    %c0_168 = arith.constant 0 : index
    %223 = vector.load %arg3[%c0_165, %c7_166, %c0_167, %c0_168] : memref<1x8x8x128xf32, #tpu.memory_space<vmem>>, vector<1x1x8x128xf32>
    %224 = vector.shape_cast %223 : vector<1x1x8x128xf32> to vector<8x128xf32>
    %cst_169 = arith.constant 4.000000e-01 : f32
    %225 = vector.broadcast %cst_169 : f32 to vector<8x128xf32>
    %226 = arith.mulf %225, %224 : vector<8x128xf32>
    %cst_170 = arith.constant 0.000000e+00 : f32
    %227 = vector.broadcast %cst_170 : f32 to vector<8x128xf32>
    %228 = arith.addf %227, %226 : vector<8x128xf32>
    %229 = arith.subf %222, %228 : vector<8x128xf32>
    %cst_171 = arith.constant 1.000000e+00 : f32
    %230 = vector.broadcast %cst_171 : f32 to vector<8x128xf32>
    %231 = arith.subf %229, %230 : vector<8x128xf32>
    %cst_172 = arith.constant 0.000000e+00 : f32
    %232 = vector.broadcast %cst_172 : f32 to vector<8x128xf32>
    %233 = arith.subf %231, %232 : vector<8x128xf32>
    %c0_173 = arith.constant 0 : index
    %c7_174 = arith.constant 7 : index
    %c0_175 = arith.constant 0 : index
    %c0_176 = arith.constant 0 : index
    %234 = vector.load %arg4[%c0_173, %c7_174, %c0_175, %c0_176] : memref<1x8x8x128xf32, #tpu.memory_space<vmem>>, vector<1x1x8x128xf32>
    %235 = vector.shape_cast %234 : vector<1x1x8x128xf32> to vector<8x128xf32>
    %cst_177 = arith.constant 4.000000e-01 : f32
    %236 = vector.broadcast %cst_177 : f32 to vector<8x128xf32>
    %237 = arith.mulf %236, %235 : vector<8x128xf32>
    %238 = arith.subf %233, %237 : vector<8x128xf32>
    %cst_178 = arith.constant 0.000000e+00 : f32
    %239 = vector.broadcast %cst_178 : f32 to vector<8x128xf32>
    %240 = arith.cmpf ogt, %238, %239 : vector<8x128xf32>
    %241 = arith.extui %240 : vector<8x128xi1> to vector<8x128xi32>
    %242 = arith.sitofp %241 : vector<8x128xi32> to vector<8x128xf32>
    %c0_179 = arith.constant 0 : index
    %c7_180 = arith.constant 7 : index
    %c0_181 = arith.constant 0 : index
    %c0_182 = arith.constant 0 : index
    %243 = vector.load %arg5[%c0_179, %c7_180, %c0_181, %c0_182] : memref<1x8x8x128xf32, #tpu.memory_space<vmem>>, vector<1x1x8x128xf32>
    %244 = vector.shape_cast %243 : vector<1x1x8x128xf32> to vector<8x128xf32>
    %245 = vector.shape_cast %242 : vector<8x128xf32> to vector<1x1x8x128xf32>
    tpu.vector_store %arg5[%c0_179, %c7_180, %c0_181, %c0_182], %245 {strides = array<i32>} : memref<1x8x8x128xf32, #tpu.memory_space<vmem>>, vector<1x1x8x128xf32>,
    return
  }
  func.func @transform_0(%arg0: i32, %arg1: i32) -> (i32, i32, i32, i32) {
    %c0_i32 = arith.constant 0 : i32
    %c0_i32_0 = arith.constant 0 : i32
    %c0_i32_1 = arith.constant 0 : i32
    return %arg0, %c0_i32, %arg1, %c0_i32_0 : i32, i32, i32, i32
  }
  func.func @transform_1(%arg0: i32, %arg1: i32) -> (i32, i32, i32, i32) {
    %c0_i32 = arith.constant 0 : i32
    %c0_i32_0 = arith.constant 0 : i32
    %c0_i32_1 = arith.constant 0 : i32
    return %arg0, %c0_i32, %arg1, %c0_i32_0 : i32, i32, i32, i32
  }
  func.func @transform_2(%arg0: i32, %arg1: i32) -> (i32, i32, i32, i32) {
    %c0_i32 = arith.constant 0 : i32
    %c0_i32_0 = arith.constant 0 : i32
    %c0_i32_1 = arith.constant 0 : i32
    return %arg0, %c0_i32, %arg1, %c0_i32_0 : i32, i32, i32, i32
  }
  func.func @transform_3(%arg0: i32, %arg1: i32) -> (i32, i32, i32, i32) {
    %c0_i32 = arith.constant 0 : i32
    %c0_i32_0 = arith.constant 0 : i32
    %c0_i32_1 = arith.constant 0 : i32
    return %arg0, %c0_i32, %arg1, %c0_i32_0 : i32, i32, i32, i32
  }
}

</mosaic_0001>

<bundles_post_ra>
// kernel: tpu_custom_call.1
= control target key start
LH: loop header
LB: loop body
LE: loop exit
PB: predicated region body
PF: predicated region fallthrough
CT: control target
= control target key end

     0   :  { %s1279_s0 = inlined_call_operand.hbm [shape: f32[2,8,8,128], index: 0, kind: input, shape index: {}]   ;;  %s1280_s1 = inlined_call_operand.hbm [shape: f32[2,8,8,128], index: 1, kind: input, shape index: {}]   ;;  %s1281_s2 = inlined_call_operand.hbm [shape: f32[2,8,8,128], index: 2, kind: input, shape index: {}]   ;;  %s1282_s3 = inlined_call_operand.hbm [shape: f32[2,8,8,128], index: 3, kind: output, shape index: {}]  }
   0x1   :  { %1292 = sst [smem:[#allocation15_spill]] %s1280_s1 }
   0x2   :  { %8 = vsyncpa [#allocation3], 0 }
   0x3   :  { %10 = vsyncpa [#allocation3 + $0x1], 0 }
   0x4   :  { %11 = vsyncpa [#allocation6], 0 }
   0x5   :  { %13 = vsyncpa [#allocation6 + $0x1], 0 }
   0x6   :  { %14 = vsyncpa [#allocation4], 0 }
   0x7   :  { %16 = vsyncpa [#allocation4 + $0x1], 0  ;;  %s952_s12 = smov 0   ;;  %s954_s13 = smov 0  }
   0x8   :  { %s956_s14 = smov 0   ;;  %s958_s15 = smov 0  }
   0x9   :  { %s960_s16 = smov 0   ;;  %s962_s17 = smov 0  }
   0xa LB: > { %1293 = sst [smem:[#allocation12_spill]] %s917_s16  ;;  %s983_s18 = sadd.s32 4294967295, %s921_s17   ;;  %s921_s17 = sphi %s962_s17, %s22_s17   ;;  %s917_s16 = sphi %s960_s16, %s1316_s16   ;;  %s913_s15 = sphi %s958_s15, %s1315_s15   ;;  %s909_s14 = sphi %s956_s14, %s1319_s14   ;;  %s905_s13 = sphi %s954_s13, %s1318_s13   ;;  %s901_s12 = sphi %s952_s12, %s1317_s12  }
   0xb   : > { %s598_s19 = sadd.s32 4294967294, %s921_s17   ;;  %s34_s20 = sadd.s32 1, %s917_s16 }
   0xc   : > { %s43_s21 = sadd.s32 1, %s909_s14  ;;  %p36_p0 = scmp.ge.s32.totalorder %s34_s20, 2 }
   0xd   : > { %p50_p1 = scmp.ne.s32.totalorder %s909_s14, %s905_s13  ;;  %p51_p2 = scmp.eq.s32.totalorder %s921_s17, 0 }
   0xe   : > { %p56_p3 = scmp.ne.s32.totalorder %s905_s13, %s901_s12  ;;  %s1321_s20 = smov (%p36_p0, %s34_s20), 0 }
   0xf   : > { %1294 = sst [smem:[#allocation13_spill]] %s1321_s20  ;;  %p995_p4 = por %p51_p2, %p50_p1 }
  0x10   : > { %p57_p5 = scmp.eq.s32.totalorder %s983_s18, 0  ;;  %s38_s23 = ssub.s32 %s917_s16, %s1321_s20 }
  0x11   : > { %p138_p6 = scmp.eq.s32.totalorder %s983_s18, 1  ;;  %p41_p7 = scmp.eq.s32.totalorder %s38_s23, 0 }
  0x12   : > { %p1003_p8 = por %p57_p5, %p56_p3  ;;  %p144_p10 = scmp.eq.s32.totalorder %s598_s19, 1 }
  0x13   : > { %p1007_p9 = por %p138_p6, %p50_p1  ;;  %p690_p13 = scmp.lt.s32.totalorder %s921_s17, 2 }
  0x14   : > { %s1296_s24 = scalar_select %p1003_p8, 1, 0 }
  0x15   : > { %s1297_s25 = scalar_select %p1007_p9, 1, 0 }
  0x16   : > { %s1012_s26 = scalar_select %p41_p7, %s909_s14, %s43_s21  }
  0x17   : > { %p1014_p11 = por %p144_p10, %p56_p3  ;;  %s1285_s28 = sand.u32 1, %s909_s14  }
  0x18   : > { %1298 = sst [smem:[#allocation14_spill]] %s1012_s26  ;;  %s1023_s29 = sshll.u32 %s1285_s28, 6 }
  0x19   : > { %s1299_s27 = scalar_select %p1014_p11, 1, 0 }
  0x1a   : > { %s1026_s30 = sshll.u32 %s917_s16, 10  ;;  %p1030_p0 = pnand %p690_p13, %p995_p4 }
  0x1b   : > { %s186_s5 = sand.u32 1, %s921_s17   ;;  %s1301_s1 = sld [smem:[#allocation15_spill]] }
  0x1c   : > { %s190_s9 = scalar_lea.vmem [#allocation5], %s1023_s29  ;;  %s1046_s11 = scalar_lea.sflag [#allocation6], %s186_s5 }
  0x1d   : > { %s198_s10 = sshll.u32 %s190_s9, 4  ;;  %p1052_p4 = pneg %p1030_p0  ;;  %s1043_s10 = int_to_ptr.vmem [resolvable:$true] %s198_s10 }
  0x21   : > { %s1039_s8 = scalar_lea.hbm %s1301_s1, %s1026_s30  ;;  %s750_s6 = scalar_lea.hbm %s1301_s1, 2048 }
  0x22   : > { %s745_s19 = scalar_lea.hbm %s1039_s8, 1024  ;;  %p751_p7 = scmp.lt.u32.totalorder %s1039_s8, %s1301_s1 }
  0x23   : > { %p746_p3 = scmp.ne.s32.totalorder %s1039_s8, %s745_s19  ;;  %p752_p10 = scmp.lt.u32.totalorder %s750_s6, %s745_s19 }
  0x24   : > { %p754_p12 = scmp.lt.u32.totalorder %s745_s19, %s1039_s8 }
  0x25   : > { %p748_p5 = pnand %p1052_p4, %p746_p3  ;;  %p753_p13 = por %p752_p10, %p751_p7 }
  0x27   : > { %p749_p6 = pneg %p748_p5  ;;  %p755_p1 = por %p754_p12, %p753_p13 }
  0x29   : > { %p756_p2 = pnand %p755_p1, %p749_p6 }
  0x2b   : > { %759 = shalt.err (!%p756_p2)
}
  0x2c   : > { %s760_s5 = scalar_lea.vmem %s1043_s10, 1024  ;;  %s923_s22 = smov [#allocation5]  }
  0x2d   : > { %p761_p3 = scmp.ne.s32.totalorder %s1043_s10, %s760_s5  ;;  %s765_s23 = sshll.u32 %s923_s22, 4  ;;  %s766_s23 = int_to_ptr.vmem [resolvable:$false] %s765_s23 }
  0x2e   : > { %s767_s7 = scalar_lea.vmem %s766_s23, 2048  ;;  %p768_p9 = scmp.lt.s32.totalorder %s1043_s10, %s766_s23 }
  0x2f   : > { %p763_p5 = pnand %p761_p3, %p1052_p4  ;;  %p769_p8 = scmp.lt.s32.totalorder %s767_s7, %s760_s5 }
  0x31   : > { %p764_p11 = pneg %p763_p5  ;;  %p770_p7 = por %p769_p8, %p768_p9 }
  0x33   : > { %p771_p10 = pnand %p770_p7, %p764_p11 }
  0x35   : > { %774 = shalt.err (!%p771_p10)
}
  0x36   : > { %s1286_s19 = smov 128   ;;  %s1288_s6 = smov 8  }
  0x37   : > { %682 = dma.hbm_to_vmem [thread:$0]  (!%p1030_p0), %s1039_s8, 1024, %s1043_s10, %s1046_s11, %s1286_s19, %s1286_s19, %s1288_s6  }
  0x38   : > { %p1303_p8 = scmp.lt.s32.totalorder %s921_s17, 3  ;;  %p1304_p9 = scmp.ge.s32.totalorder %s921_s17, 1 }
  0x39   : > { %s1091_s23 = scalar_lea.hbm %s1279_s0, %s1026_s30  ;;  %s168_s7 = scalar_lea.vmem [#allocation2], %s1023_s29 }
  0x3a   : > { %p1083_p11 = pnand %p1304_p9, %p1303_p8  ;;  %s176_s28 = sshll.u32 %s168_s7, 4  ;;  %s1094_s28 = int_to_ptr.vmem [resolvable:$true] %s176_s28 }
  0x3b   : > { %s1100_s19 = scalar_lea.hbm %s1281_s2, %s1026_s30  ;;  %s1306_s6 = sand.u32 1, %s909_s14  }
  0x3c   : > { %s1305_s9 = scalar_select %p1083_p11, 1, 0 }
  0x3d   : > { %s1104_s1 = scalar_lea.sflag [#allocation3], %s1306_s6  ;;  %s775_s20 = scalar_lea.hbm %s1091_s23, 1024 }
  0x3e   : > { %p776_p12 = scmp.ne.s32.totalorder %s1091_s23, %s775_s20  ;;  %s780_s16 = scalar_lea.hbm %s1279_s0, 2048 }
  0x3f   : > { %p781_p6 = scmp.lt.u32.totalorder %s1091_s23, %s1279_s0  ;;  %p782_p13 = scmp.lt.u32.totalorder %s780_s16, %s775_s20 }
  0x40   : > { %p778_p1 = pnand %p776_p12, %p1052_p4  ;;  %p784_p5 = scmp.lt.u32.totalorder %s775_s20, %s1091_s23 }
  0x41   : > { %p783_p3 = por %p782_p13, %p781_p6 }
  0x42   : > { %p779_p2 = pneg %p778_p1 }
  0x43   : > { %p785_p7 = por %p784_p5, %p783_p3 }
  0x45   : > { %p786_p10 = pnand %p785_p7, %p779_p2 }
  0x47   : > { %789 = shalt.err (!%p786_p10)
}
  0x48   : > { %s790_s30 = scalar_lea.vmem %s1094_s28, 1024  ;;  %s926_s6 = smov [#allocation2]  }
  0x49   : > { %p791_p8 = scmp.ne.s32.totalorder %s1094_s28, %s790_s30  ;;  %s795_s8 = sshll.u32 %s926_s6, 4  ;;  %s796_s8 = int_to_ptr.vmem [resolvable:$false] %s795_s8 }
  0x4a   : > { %s797_s26 = scalar_lea.vmem %s796_s8, 2048  ;;  %p798_p1 = scmp.lt.s32.totalorder %s1094_s28, %s796_s8 }
  0x4b   : > { %p793_p9 = pnand %p791_p8, %p1052_p4  ;;  %p799_p11 = scmp.lt.s32.totalorder %s797_s26, %s790_s30 }
  0x4d   : > { %p794_p12 = pneg %p793_p9  ;;  %p800_p6 = por %p799_p11, %p798_p1 }
  0x4f   : > { %p801_p13 = pnand %p800_p6, %p794_p12 }
  0x51   : > { %804 = shalt.err (!%p801_p13)
}
  0x52   : > { %s1307_s16 = smov 8   ;;  %s1308_s20 = smov 128  }
  0x53   : > { %679 = dma.hbm_to_vmem [thread:$0]  (!%p1030_p0), %s1091_s23, 1024, %s1094_s28, %s1104_s1, %s1308_s20, %s1308_s20, %s1307_s16  }
  0x54   : > { %s212_s10 = scalar_lea.vmem [#allocation7], %s1023_s29  ;;  %s805_s22 = scalar_lea.hbm %s1100_s19, 1024 }
  0x55   : > { %s220_s5 = sshll.u32 %s212_s10, 4  ;;  %p806_p11 = scmp.ne.s32.totalorder %s1100_s19, %s805_s22  ;;  %s1132_s5 = int_to_ptr.vmem [resolvable:$true] %s220_s5 }
  0x56   : > { %s810_s6 = scalar_lea.hbm %s1281_s2, 2048  ;;  %p811_p5 = scmp.lt.u32.totalorder %s1100_s19, %s1281_s2 }
  0x57   : > { %p808_p2 = pnand %p806_p11, %p1052_p4  ;;  %p812_p7 = scmp.lt.u32.totalorder %s810_s6, %s805_s22 }
  0x58   : > { %p814_p8 = scmp.lt.u32.totalorder %s805_s22, %s1100_s19 }
  0x59   : > { %p809_p3 = pneg %p808_p2  ;;  %p813_p10 = por %p812_p7, %p811_p5 }
  0x5b   : > { %p815_p9 = por %p814_p8, %p813_p10 }
  0x5d   : > { %p816_p12 = pnand %p815_p9, %p809_p3 }
  0x5f   : > { %819 = shalt.err (!%p816_p12)
}
  0x60   : > { %s820_s1 = scalar_lea.vmem %s1132_s5, 1024  ;;  %s927_s28 = smov [#allocation7]  }
  0x61   : > { %p821_p1 = scmp.ne.s32.totalorder %s1132_s5, %s820_s1  ;;  %s825_s29 = sshll.u32 %s927_s28, 4  ;;  %s826_s29 = int_to_ptr.vmem [resolvable:$false] %s825_s29 }
  0x62   : > { %s827_s23 = scalar_lea.vmem %s826_s29, 2048  ;;  %p828_p11 = scmp.lt.s32.totalorder %s1132_s5, %s826_s29 }
  0x63   : > { %p823_p6 = pnand %p821_p1, %p1052_p4  ;;  %p829_p2 = scmp.lt.s32.totalorder %s827_s23, %s820_s1 }
  0x65   : > { %p824_p13 = pneg %p823_p6  ;;  %p830_p5 = por %p829_p2, %p828_p11 }
  0x67   : > { %p831_p7 = pnand %p830_p5, %p824_p13 }
  0x69   : > { %834 = shalt.err (!%p831_p7)
}
  0x6a   : > { %685 = dma.hbm_to_vmem [thread:$0]  (!%p1030_p0), %s1100_s19, 1024, %s1132_s5, %s1046_s11, %s1308_s20, %s1308_s20, %s1307_s16  }
  0x6b   : > { %p1309_p4 = scmp.ne.s32.totalorder %s1305_s9, 0 }
  0x6c   : > { %s1162_s21 = sand.u32 (!%p1309_p4), 1, %s905_s13   ;;  %p1310_p3 = scmp.ne.s32.totalorder (!%p1309_p4), %s1296_s24, 0 }
  0x6d   : > { %232 = sbr.rel (%p1309_p4) target bundleno = 259 (0x103), region = 32  ;;  %s611_s10 = sshll.u32 (!%p1309_p4), %s1162_s21, 6 }
  0x6e   : > { %s235_s22 = scalar_lea.sflag (!%p1309_p4), [#allocation3], %s1162_s21  ;;  %s1166_s7 = scalar_lea.vmem (!%p1309_p4), [#allocation2], %s611_s10 }
  0x74   : > { %888 = dma.done.wait (%p1310_p3), %s235_s22, 1024  }
  0x75   : > { %890 = vsyncadd (%p1310_p3), %s235_s22, 4294966272  ;;  %s243_s4 = sand.u32 1, %s983_s18   ;;  %s1173_s19 = scalar_lea.vmem [#allocation5], %s611_s10 }
  0x76   : > { %s244_s11 = scalar_lea.sflag [#allocation6], %s243_s4 }
  0x77   : > { %892 = dma.done.wait (%p1310_p3), %s244_s11, 2048  }
  0x78   : > { %894 = vsyncadd (%p1310_p3), %s244_s11, 4294965248  ;;  %v289_v0 = vld [vmem:[%s1166_s7] sm:$0xff]  ;;  %s1181_s9 = scalar_lea.vmem [#allocation7], %s611_s10  ;;  %v928_v8 = vmov 0.0   ;;  %s1185_s18 = scalar_lea.vmem [#allocation8], %s611_s10  ;;  %v618_v11 = vld [vmem:[%s1173_s19 + $0x8] sm:$0xff] }
  0x79   : > { %v291_v1 = vld [vmem:[%s1173_s19] sm:$0xff]  ;;  %v617_v13 = vld [vmem:[%s1166_s7 + $0x8] sm:$0xff]  ;;  %v311_v15 = vmul.f32 0.4, %v618_v11  ;;  %v624_v24 = vld [vmem:[%s1173_s19 + $0x10] sm:$0xff]  ;;  %s465_s24 = sshll.u32 %s1185_s18, 4  ;;  %s1223_s24 = int_to_ptr.vmem [resolvable:$true] %s465_s24 }
  0x7a   : > { %v296_v2 = vld [vmem:[%s1181_s9] sm:$0xff]  ;;  %v292_v3 = vmul.f32 0.4, %v291_v1  ;;  %v620_v16 = vld [vmem:[%s1181_s9 + $0x8] sm:$0xff]  ;;  %v623_v26 = vld [vmem:[%s1166_s7 + $0x10] sm:$0xff]  ;;  %s667_s16 = sshll.u32 %s913_s15, 10 }
  0x7b   : > { %v297_v5 = vmul.f32 0.4, %v296_v2  ;;  %v317_v19 = vmul.f32 0.4, %v620_v16  ;;  %v332_v28 = vmul.f32 0.4, %v624_v24  ;;  %s1228_s30 = scalar_lea.hbm %s1282_s3, %s667_s16 }
  0x7c   : > { %v294_v4 = vsub.f32 %v289_v0, %v292_v3  ;;  %v626_v29 = vld [vmem:[%s1181_s9 + $0x10] sm:$0xff]  ;;  %v630_v37 = vld [vmem:[%s1173_s19 + $0x18] sm:$0xff]  ;;  %v636_v50 = vld [vmem:[%s1173_s19 + $0x20] sm:$0xff]  ;;  %s451_s6 = scalar_lea.sflag [#allocation4], %s1162_s21  ;;  %s835_s8 = scalar_lea.vmem %s1223_s24, 1024 }
  0x7d   : > { %v338_v32 = vmul.f32 0.4, %v626_v29  ;;  %v629_v39 = vld [vmem:[%s1166_s7 + $0x18] sm:$0xff]  ;;  %v353_v41 = vmul.f32 0.4, %v630_v37  ;;  %v635_v52 = vld [vmem:[%s1166_s7 + $0x20] sm:$0xff]  ;;  %p836_p0 = scmp.ne.s32.totalorder %s1223_s24, %s835_s8 }
  0x7e   : > { %v615_v6 = vadd.f32 -1.0, %v294_v4  ;;  %v632_v42 = vld [vmem:[%s1181_s9 + $0x18] sm:$0xff]  ;;  %v374_v54 = vmul.f32 0.4, %v636_v50  ;;  %v638_v55 = vld [vmem:[%s1181_s9 + $0x20] sm:$0xff]  ;;  %v642_v63 = vld [vmem:[%s1173_s19 + $0x28] sm:$0xff] }
  0x7f   : > { %v359_v45 = vmul.f32 0.4, %v632_v42  ;;  %v380_v58 = vmul.f32 0.4, %v638_v55  ;;  %v641_v1 = vld [vmem:[%s1166_s7 + $0x28] sm:$0xff]  ;;  %p1311_p10 = scmp.ne.s32.totalorder %s1297_s25, 0 }
  0x80   : > { %v298_v7 = vsub.f32 %v615_v6, %v297_v5  ;;  %v395_v3 = vmul.f32 0.4, %v642_v63  ;;  %s929_s15 = smov [#allocation8]  }
  0x81   : > { %p837_p8 = pnand %p836_p0, %p1311_p10  ;;  %s839_s26 = sshll.u32 %s929_s15, 4  ;;  %s840_s26 = int_to_ptr.vmem [resolvable:$false] %s839_s26 }
  0x82   : > { %vm299_vm0 = vcmp.gt.f32.partialorder %v298_v7, 0.0  ;;  %s841_s1 = scalar_lea.vmem %s840_s26, 2048  ;;  %p842_p12 = scmp.lt.s32.totalorder %s1223_s24, %s840_s26 }
  0x83   : > { %v616_v9 = vsel %vm299_vm0, 1.0, %v928_v8  ;;  %p838_p9 = pneg %p837_p8  ;;  %p843_p1 = scmp.lt.s32.totalorder %s841_s1, %s835_s8 }
  0x84   : > { %302 = vst [vmem:[%s1185_s18] sm:$0xff] %v616_v9  ;;  %v303_v10 = vsub.f32 1.0, %v616_v9 }
  0x85   : > { %p844_p6 = por %p843_p1, %p842_p12 }
  0x86   : > { %v304_v12 = vmul.f32 %v303_v10, %v294_v4  ;;  %v644_v4 = vld [vmem:[%s1181_s9 + $0x28] sm:$0xff] }
  0x87   : > { %v401_v7 = vmul.f32 0.4, %v644_v4  ;;  %p845_p13 = pnand %p844_p6, %p838_p9 }
  0x88   : > { %v305_v14 = vmul.f32 0.5, %v304_v12 }
  0x8a   : > { %v308_v17 = vadd.f32 %v617_v13, %v305_v14  ;;  %v648_v13 = vld [vmem:[%s1173_s19 + $0x30] sm:$0xff] }
  0x8c   : > { %v313_v18 = vsub.f32 %v308_v17, %v311_v15  ;;  %v647_v15 = vld [vmem:[%s1166_s7 + $0x30] sm:$0xff]  ;;  %v416_v17 = vmul.f32 0.4, %v648_v13 }
  0x8e   : > { %v619_v20 = vadd.f32 -1.0, %v313_v18 }
  0x90   : > { %v318_v21 = vsub.f32 %v619_v20, %v317_v19 }
  0x92   : > { %vm319_vm1 = vcmp.gt.f32.partialorder %v318_v21, 0.0 }
  0x93   : > { %v621_v22 = vsel %vm319_vm1, 1.0, %v928_v8 }
  0x94   : > { %622 = vst [vmem:[%s1185_s18 + $0x8] sm:$0xff] %v621_v22  ;;  %v324_v23 = vsub.f32 1.0, %v621_v22 }
  0x96   : > { %v325_v25 = vmul.f32 %v324_v23, %v313_v18  ;;  %v650_v18 = vld [vmem:[%s1181_s9 + $0x30] sm:$0xff] }
  0x97   : > { %v422_v21 = vmul.f32 0.4, %v650_v18 }
  0x98   : > { %v326_v27 = vmul.f32 0.5, %v325_v25 }
  0x9a   : > { %v329_v30 = vadd.f32 %v623_v26, %v326_v27  ;;  %v654_v26 = vld [vmem:[%s1173_s19 + $0x38] sm:$0xff] }
  0x9c   : > { %v334_v31 = vsub.f32 %v329_v30, %v332_v28  ;;  %v653_v28 = vld [vmem:[%s1166_s7 + $0x38] sm:$0xff]  ;;  %v437_v30 = vmul.f32 0.4, %v654_v26 }
  0x9e   : > { %v625_v33 = vadd.f32 -1.0, %v334_v31 }
  0xa0   : > { %v339_v34 = vsub.f32 %v625_v33, %v338_v32 }
  0xa2   : > { %vm340_vm2 = vcmp.gt.f32.partialorder %v339_v34, 0.0 }
  0xa3   : > { %v627_v35 = vsel %vm340_vm2, 1.0, %v928_v8 }
  0xa4   : > { %628 = vst [vmem:[%s1185_s18 + $0x10] sm:$0xff] %v627_v35  ;;  %v345_v36 = vsub.f32 1.0, %v627_v35 }
  0xa6   : > { %v346_v38 = vmul.f32 %v345_v36, %v334_v31  ;;  %v656_v31 = vld [vmem:[%s1181_s9 + $0x38] sm:$0xff] }
  0xa7   : > { %v443_v34 = vmul.f32 0.4, %v656_v31 }
  0xa8   : > { %v347_v40 = vmul.f32 0.5, %v346_v38 }
  0xaa   : > { %v350_v43 = vadd.f32 %v629_v39, %v347_v40 }
  0xac   : > { %v355_v44 = vsub.f32 %v350_v43, %v353_v41 }
  0xae   : > { %v631_v46 = vadd.f32 -1.0, %v355_v44 }
  0xb0   : > { %v360_v47 = vsub.f32 %v631_v46, %v359_v45 }
  0xb2   : > { %vm361_vm3 = vcmp.gt.f32.partialorder %v360_v47, 0.0 }
  0xb3   : > { %v633_v48 = vsel %vm361_vm3, 1.0, %v928_v8 }
  0xb4   : > { %634 = vst [vmem:[%s1185_s18 + $0x18] sm:$0xff] %v633_v48  ;;  %v366_v49 = vsub.f32 1.0, %v633_v48 }
  0xb6   : > { %v367_v51 = vmul.f32 %v366_v49, %v355_v44 }
  0xb8   : > { %v368_v53 = vmul.f32 0.5, %v367_v51 }
  0xba   : > { %v371_v56 = vadd.f32 %v635_v52, %v368_v53 }
  0xbc   : > { %v376_v57 = vsub.f32 %v371_v56, %v374_v54 }
  0xbe   : > { %v637_v59 = vadd.f32 -1.0, %v376_v57 }
  0xc0   : > { %v381_v60 = vsub.f32 %v637_v59, %v380_v58 }
  0xc2   : > { %vm382_vm4 = vcmp.gt.f32.partialorder %v381_v60, 0.0 }
  0xc3   : > { %v639_v61 = vsel %vm382_vm4, 1.0, %v928_v8 }
  0xc4   : > { %640 = vst [vmem:[%s1185_s18 + $0x20] sm:$0xff] %v639_v61  ;;  %v387_v62 = vsub.f32 1.0, %v639_v61 }
  0xc6   : > { %v388_v0 = vmul.f32 %v387_v62, %v376_v57 }
  0xc8   : > { %v389_v2 = vmul.f32 0.5, %v388_v0 }
  0xca   : > { %v392_v5 = vadd.f32 %v641_v1, %v389_v2 }
  0xcc   : > { %v397_v6 = vsub.f32 %v392_v5, %v395_v3 }
  0xce   : > { %v643_v9 = vadd.f32 -1.0, %v397_v6 }
  0xd0   : > { %v402_v10 = vsub.f32 %v643_v9, %v401_v7 }
  0xd2   : > { %vm403_vm5 = vcmp.gt.f32.partialorder %v402_v10, 0.0 }
  0xd3   : > { %v645_v11 = vsel %vm403_vm5, 1.0, %v928_v8 }
  0xd4   : > { %646 = vst [vmem:[%s1185_s18 + $0x28] sm:$0xff] %v645_v11  ;;  %v408_v12 = vsub.f32 1.0, %v645_v11 }
  0xd6   : > { %v409_v14 = vmul.f32 %v408_v12, %v397_v6 }
  0xd8   : > { %v410_v16 = vmul.f32 0.5, %v409_v14 }
  0xda   : > { %v413_v19 = vadd.f32 %v647_v15, %v410_v16 }
  0xdc   : > { %v418_v20 = vsub.f32 %v413_v19, %v416_v17 }
  0xde   : > { %v649_v22 = vadd.f32 -1.0, %v418_v20 }
  0xe0   : > { %v423_v23 = vsub.f32 %v649_v22, %v422_v21 }
  0xe2   : > { %vm424_vm6 = vcmp.gt.f32.partialorder %v423_v23, 0.0 }
  0xe3   : > { %v651_v24 = vsel %vm424_vm6, 1.0, %v928_v8 }
  0xe4   : > { %652 = vst [vmem:[%s1185_s18 + $0x30] sm:$0xff] %v651_v24  ;;  %v429_v25 = vsub.f32 1.0, %v651_v24 }
  0xe6   : > { %v430_v27 = vmul.f32 %v429_v25, %v418_v20 }
  0xe8   : > { %v431_v29 = vmul.f32 0.5, %v430_v27 }
  0xea   : > { %v434_v32 = vadd.f32 %v653_v28, %v431_v29 }
  0xec   : > { %v439_v33 = vsub.f32 %v434_v32, %v437_v30 }
  0xee   : > { %v655_v35 = vadd.f32 -1.0, %v439_v33 }
  0xf0   : > { %v444_v36 = vsub.f32 %v655_v35, %v443_v34 }
  0xf2   : > { %vm445_vm7 = vcmp.gt.f32.partialorder %v444_v36, 0.0 }
  0xf3   : > { %v657_v37 = vsel %vm445_vm7, 1.0, %v928_v8 }
  0xf4   : > { %658 = vst [vmem:[%s1185_s18 + $0x38] sm:$0xff] %v657_v37 }
  0xf5   : > { %848 = shalt.err (!%p845_p13)
}
  0xf6   : > { %s849_s28 = scalar_lea.hbm %s1228_s30, 1024  ;;  %s853_s10 = scalar_lea.hbm %s1282_s3, 2048 }
  0xf7   : > { %p850_p11 = scmp.ne.s32.totalorder %s1228_s30, %s849_s28  ;;  %p854_p7 = scmp.lt.u32.totalorder %s1228_s30, %s1282_s3 }
  0xf8   : > { %p855_p4 = scmp.lt.u32.totalorder %s853_s10, %s849_s28  ;;  %p857_p0 = scmp.lt.u32.totalorder %s849_s28, %s1228_s30 }
  0xf9   : > { %p851_p2 = pnand %p850_p11, %p1311_p10 }
  0xfa   : > { %p856_p3 = por %p855_p4, %p854_p7 }
  0xfb   : > { %p852_p5 = pneg %p851_p2 }
  0xfc   : > { %p858_p8 = por %p857_p0, %p856_p3 }
  0xfe   : > { %p859_p9 = pnand %p858_p8, %p852_p5 }
 0x100   : > { %862 = shalt.err (!%p859_p9)
}
 0x101   : > { %s930_s4 = smov 128   ;;  %s931_s11 = smov 8  }
 0x102   : > { %674 = dma.vmem_to_hbm [thread:$0]  (%p1311_p10), %s1223_s24, 1024, %s1228_s30, %s451_s6, %s930_s4, %s930_s4, %s931_s11  }
 0x103 PF: > { %s480_s19 = sand.u32 1, %s901_s12   ;;  %p1312_p12 = scmp.ne.s32.totalorder %s1299_s27, 0 }
 0x104   : > { %p1313_p1 = scmp.ge.s32.totalorder %s921_s17, 2  ;;  %s481_s9 = scalar_lea.sflag [#allocation4], %s480_s19 }
 0x106   : > { %p687_p6 = pnand %p1313_p1, %p1312_p12 }
 0x108   : > { %896 = dma.done.wait (!%p687_p6), %s481_s9, 1024  }
 0x109   : > { %898 = vsyncadd (!%p687_p6), %s481_s9, 4294966272  ;;  %s22_s17 = sadd.s32 1, %s921_s17   ;;  %s1314_s18 = sld [smem:[#allocation14_spill]] }
 0x10a   : > { %p19_p13 = scmp.ge.s32.totalorder %s22_s17, 4   ;;  %s1315_s15 = sld [smem:[#allocation12_spill]] }
 0x10b   : > { %s1316_s16 = sld [smem:[#allocation13_spill]]  ;;  %s1317_s12 = smov %s905_s13 }
 0x10c   : > { %s1318_s13 = smov %s909_s14  ;;  %21 = sbr.rel (!%p19_p13) target bundleno = 10 (0xa), region = 129 }
 0x10f   : > { %s1319_s14 = smov %s1314_s18 }
 0x113   :  { %486 = vsyncpa [#allocation3], 1 }
 0x114   :  { %488 = vsyncpa [#allocation3 + $0x1], 1 }
 0x115   :  { %489 = vsyncpa [#allocation6], 1 }
 0x116   :  { %491 = vsyncpa [#allocation6 + $0x1], 1 }
 0x117   :  { %492 = vsyncpa [#allocation4], 1 }
 0x118   :  { %494 = vsyncpa [#allocation4 + $0x1], 1 }

</bundles_post_ra>
